<compile_context>
chip_gen: v6e
topology: v6e:2x2x1
jax: 0.10.0
libtpu: 0.0.40
codegen_flags: <defaults>
</compile_context>

<pallas_src>
import math
from functools import partial

import numpy as np
import jax
import jax.numpy as jnp
from jax.experimental import pallas as pl
from jax.experimental.pallas import tpu as pltpu


# ----------------------------------------------------------------------------
# Constants / small helpers
# ----------------------------------------------------------------------------

CP = 128            # lane-padded channel width for every conv output
TM_MAX = 512        # GEMM rows per grid step (fits v5e's 16 MiB scoped VMEM)
BN_EPS = 1e-5
LN_EPS = 1e-5
LRELU_ALPHA = 0.1

LAYER_CFG = [(1, 16, 3), (16, 32, 3), (32, 64, 1), (64, 128, 1)]  # (cin, cout, k)
THRESHOLD = 1.5
DIMENSIONS = 128    # must be 128 for ln1(fc1(x)) to be well-typed in the reference

_CompilerParams = getattr(pltpu, "CompilerParams", None) or getattr(
    pltpu, "TPUCompilerParams", None)


def _mosaic_params(**kw):
    if _CompilerParams is None:
        return None
    try:
        return _CompilerParams(**kw)
    except TypeError:
        return None


def _round_up(x, m):
    return ((x + m - 1) // m) * m


def _uniform(key, shape, bound):
    return jax.random.uniform(key, shape, jnp.float32, -bound, bound)


# ----------------------------------------------------------------------------
# Deterministic parameter construction (plain numpy / jax.random glue)
# ----------------------------------------------------------------------------

def klein_filters_np(in_channels, out_channels, kernel_size):
    """Exact analytic version of klein_filter_generator (dblquad of a degree-2
    polynomial over each rectangular cell). Uninitialized channels -> 0."""
    size = 2 * kernel_size + 1
    filt = np.zeros((out_channels, in_channels, size, size), dtype=np.float64)
    d = int(math.floor(math.sqrt(out_channels)))
    for i in range(d):
        for k in range(d):
            t1 = math.pi * (i / d)
            t2 = math.pi * (k / d)
            a, b = math.cos(t1), math.sin(t1)
            st2, ct2 = math.sin(t2), math.cos(t2)
            for n in range(size):
                x0 = -1.0 + 2.0 * n / size
                x1 = -1.0 + 2.0 * (n + 1) / size
                for m in range(size):
                    y0 = -1.0 + 2.0 * m / size
                    y1 = -1.0 + 2.0 * (m + 1) / size
                    dx, dy = x1 - x0, y1 - y0
                    I0 = dx * dy
                    I1 = a * (x1**2 - x0**2) / 2.0 * dy + b * dx * (y1**2 - y0**2) / 2.0
                    I2 = (a * a) * (x1**3 - x0**3) / 3.0 * dy \
                        + 2.0 * a * b * ((x1**2 - x0**2) / 2.0) * ((y1**2 - y0**2) / 2.0) \
                        + (b * b) * dx * (y1**3 - y0**3) / 3.0
                    val = st2 * I1 + ct2 * (2.0 * I2 - I0)
                    filt[i * d + k, :, n, m] = val
    return filt


def klein_prune_mask(out_channels, in_channels, kh, kw, threshold):
    """KleinPruningMethod.compute_mask with the metric integral evaluated by
    4-point Gauss-Legendre (exact: integrand is a degree-4 polynomial)."""
    mask = np.ones((out_channels, in_channels, kh, kw), dtype=np.float64)
    d1 = int(math.floor(math.sqrt(in_channels)))
    d2 = int(math.floor(math.sqrt(out_channels)))
    xs, wts = np.polynomial.legendre.leggauss(4)
    X, Y = np.meshgrid(xs, xs, indexing="ij")
    WW = np.outer(wts, wts)

    def Fv(t1, t2):
        u = math.cos(t1) * X + math.sin(t1) * Y
        return math.sin(t2) * u + math.cos(t2) * (2.0 * u * u - 1.0)

    for i in range(d1):
        for k in range(d1):
            t1 = math.pi * (i / d1)
            t2 = math.pi * (k / d1)
            Fa = Fv(t1, t2)
            for a in range(d2):
                for b in range(d2):
                    m1 = math.pi * (a / d2)
                    m2 = math.pi * (b / d2)
                    diff = Fa - Fv(m1, m2)
                    dist = math.sqrt(float(np.sum(WW * diff * diff)))
                    if dist > threshold:
                        mask[a * d2 + b, i * d1 + k, :, :] = 0.0
    return mask


def _pack_conv(w_oihw, bias, gamma, beta):
    """Pre-pack a conv: (O,I,KH,KW) -> lane-aligned (Kp, 128) bf16 GEMM matrix
    plus 128-padded f32 bias / gamma / beta row vectors (done once at build)."""
    w = np.asarray(w_oihw, np.float32)
    Cout, Cin, KH, KW = w.shape
    K = KH * KW * Cin
    Kp = _round_up(K, 128)
    wmat = np.transpose(w, (2, 3, 1, 0)).reshape(K, Cout)   # rows ordered (kh, kw, cin)
    wpad = np.zeros((Kp, CP), np.float32)
    wpad[:K, :Cout] = wmat

    def pad_vec(v):
        out = np.zeros((1, CP), np.float32)
        out[0, :Cout] = np.asarray(v, np.float32)
        return jnp.asarray(out)

    return dict(
        w=jnp.asarray(wpad, jnp.bfloat16),   # bf16 MXU operand, lane-dense Cout
        b=pad_vec(bias), g=pad_vec(gamma), be=pad_vec(beta),
        kh=KH, kw=KW, cout=Cout, k=K, kp=Kp,
    )


def build_params(key):
    layers = []
    for (cin, cout, ks) in LAYER_CFG:
        key, k1, k2, k3 = jax.random.split(key, 4)
        ksz = 2 * ks + 1
        k_w = klein_filters_np(cin, cout, ks)                        # KleinFilters.conv1 weight
        k_b = _uniform(k1, (cout,), 1.0 / math.sqrt(cin * ksz * ksz))
        c_w = np.asarray(_uniform(k2, (cout, cout, 3, 3), 1.0 / math.sqrt(cout * 9)))
        c_w = c_w * klein_prune_mask(cout, cout, 3, 3, THRESHOLD)    # pruned weight
        c_b = _uniform(k3, (cout,), 1.0 / math.sqrt(cout * 9))
        ones = np.ones((cout,), np.float32)
        zeros = np.zeros((cout,), np.float32)
        layers.append(dict(
            klein=_pack_conv(k_w, k_b, ones, zeros),
            conv=_pack_conv(c_w, c_b, ones, zeros),
        ))
    key, h1, h2, h3, h4 = jax.random.split(key, 5)
    bound = 1.0 / math.sqrt(128.0)
    params = dict(
        layers=layers,
        fc1_wT=jnp.transpose(_uniform(h1, (DIMENSIONS, 128), bound)),   # pre-packed (128, D)
        fc1_b=_uniform(h2, (DIMENSIONS,), bound).reshape(1, -1),
        ln_w=jnp.ones((1, 128), jnp.float32),
        ln_b=jnp.zeros((1, 128), jnp.float32),
        fc2_wT=jnp.transpose(_uniform(h3, (DIMENSIONS, 128), bound)),
        fc2_b=_uniform(h4, (DIMENSIONS,), bound).reshape(1, -1),
    )
    return params


# ----------------------------------------------------------------------------
# Pallas kernels
# ----------------------------------------------------------------------------

def _gemm_stats_kernel(p_ref, w_ref, b_ref, y_ref, sum_ref, ssq_ref,
                       *, m_total, tm, needs_mask):
    """Tiled im2col GEMM (bf16 operands, f32 accumulate) + conv bias.
    Writes a lane-dense (TM, 128) tile plus per-tile channel sum / sum-of-squares
    (padded rows masked out) for the BatchNorm batch statistics."""
    acc = jnp.dot(p_ref[...], w_ref[...], preferred_element_type=jnp.float32)
    acc = acc + b_ref[...]
    y_ref[...] = acc
    if needs_mask:
        row = jax.lax.broadcasted_iota(jnp.int32, (tm, 1), 0) + pl.program_id(0) * tm
        valid = (row < m_total).astype(jnp.float32)
        accm = acc * valid
    else:
        accm = acc
    sum_ref[...] = jnp.sum(accm, axis=0, keepdims=True).reshape(1, 1, -1)
    ssq_ref[...] = jnp.sum(accm * acc, axis=0, keepdims=True).reshape(1, 1, -1)


def _bn_lrelu_lps_kernel(c0_ref, c1_ref, c2_ref, c3_ref, sc_ref, sh_ref, o_ref,
                         *, alpha):
    """Folded BatchNorm scale/shift + LeakyReLU + polyphase-invariant pool for
    one sample: select the polyphase component with the largest L2 norm
    (first index wins ties).  c*: (1, S, 128); sc/sh: (1, 128)."""
    sc = sc_ref[...]
    sh = sh_ref[...]

    def act(ref):
        y = ref[...] * sc + sh
        return jnp.where(y >= 0, y, alpha * y)

    z0, z1, z2, z3 = act(c0_ref), act(c1_ref), act(c2_ref), act(c3_ref)
    n0 = jnp.sum(z0 * z0)
    n1 = jnp.sum(z1 * z1)
    n2 = jnp.sum(z2 * z2)
    n3 = jnp.sum(z3 * z3)
    s0 = (n0 >= n1) & (n0 >= n2) & (n0 >= n3)
    s1 = jnp.logical_not(s0) & (n1 >= n2) & (n1 >= n3)
    s2 = jnp.logical_not(s0) & jnp.logical_not(s1) & (n2 >= n3)
    s3 = jnp.logical_not(s0) & jnp.logical_not(s1) & jnp.logical_not(s2)
    o_ref[...] = (s0.astype(jnp.float32) * z0 + s1.astype(jnp.float32) * z1
                  + s2.astype(jnp.float32) * z2 + s3.astype(jnp.float32) * z3)


def _head_kernel(xf_ref, w1_ref, b1_ref, lw_ref, lb_ref, w2_ref, b2_ref, o_ref,
                 *, ln_eps, alpha):
    """AdaptiveAvgPool(1,1) + fc1 + LayerNorm + LeakyReLU + fc2 + L2 normalize."""
    x = jnp.mean(xf_ref[...], axis=1)                                    # (N, C)
    h = jnp.dot(x, w1_ref[...], preferred_element_type=jnp.float32) + b1_ref[...]
    mu = jnp.mean(h, axis=1, keepdims=True)
    var = jnp.mean(jnp.square(h - mu), axis=1, keepdims=True)
    h = (h - mu) * jax.lax.rsqrt(var + ln_eps) * lw_ref[...] + lb_ref[...]
    h = jnp.where(h >= 0, h, alpha * h)
    o = jnp.dot(h, w2_ref[...], preferred_element_type=jnp.float32) + b2_ref[...]
    nrm = jnp.sqrt(jnp.sum(o * o, axis=1, keepdims=True))
    o_ref[...] = o / jnp.maximum(nrm, 1e-12)


# ----------------------------------------------------------------------------
# Wrappers (glue: circular pad, im2col, polyphase split, reshapes)
# ----------------------------------------------------------------------------

def _circ_pad(x, p):  # NHWC circular padding of H and W by p
    if p == 0:
        return x
    x = jnp.concatenate([x[:, -p:], x, x[:, :p]], axis=1)
    x = jnp.concatenate([x[:, :, -p:], x, x[:, :, :p]], axis=2)
    return x


def conv_bn_lrelu_lps(x, cparams, padding):
    """Conv2d(circular) + BatchNorm2d(train) + LeakyReLU(0.1) + polyphase pool."""
    KH, KW, Cout = cparams["kh"], cparams["kw"], cparams["cout"]
    K, Kp = cparams["k"], cparams["kp"]
    N = x.shape[0]
    xp = _circ_pad(x, padding).astype(jnp.bfloat16)
    Hp, Wp = xp.shape[1], xp.shape[2]
    Hout, Wout = Hp - KH + 1, Wp - KW + 1
    M = N * Hout * Wout

    # TODO(synk): im2col still materializes KH*KW shifted copies in HBM (bf16
    # now, but for the 7x7 klein convs that is a 49x blowup); the next step is
    # in-kernel shifted matmuls over a halo'd NHWC tile via manual DMA.
    cols = [xp[:, kh:kh + Hout, kw:kw + Wout, :]
            for kh in range(KH) for kw in range(KW)]
    patches = jnp.concatenate(cols, axis=-1).reshape(M, K)

    tm = min(TM_MAX, _round_up(M, 8))
    mp = _round_up(M, tm)
    grid_m = mp // tm
    patches = jnp.pad(patches, ((0, mp - M), (0, Kp - K)))

    y, sums, ssqs = pl.pallas_call(
        partial(_gemm_stats_kernel, m_total=M, tm=tm, needs_mask=(mp != M)),
        grid=(grid_m,),
        in_specs=[
            pl.BlockSpec((tm, Kp), lambda i: (i, 0)),
            pl.BlockSpec((Kp, CP), lambda i: (0, 0)),
            pl.BlockSpec((1, CP), lambda i: (0, 0)),
        ],
        out_specs=[
            pl.BlockSpec((tm, CP), lambda i: (i, 0)),
            pl.BlockSpec((1, 1, CP), lambda i: (i, 0, 0)),
            pl.BlockSpec((1, 1, CP), lambda i: (i, 0, 0)),
        ],
        out_shape=(
            jax.ShapeDtypeStruct((mp, CP), jnp.float32),
            jax.ShapeDtypeStruct((grid_m, 1, CP), jnp.float32),
            jax.ShapeDtypeStruct((grid_m, 1, CP), jnp.float32),
        ),
        compiler_params=_mosaic_params(dimension_semantics=("parallel",)),
    )(patches, cparams["w"], cparams["b"])

    # Fold BN batch stats + gamma/beta into a single per-channel scale/shift.
    mean = jnp.sum(sums, axis=(0, 1)) / M                                 # (CP,)
    var = jnp.maximum(jnp.sum(ssqs, axis=(0, 1)) / M - mean * mean, 0.0)
    scale = cparams["g"] * jax.lax.rsqrt(var + BN_EPS)                    # (1, CP)
    shift = cparams["be"] - mean * scale                                  # (1, CP)

    y = y[:M].reshape(N, Hout, Wout, CP)
    if Hout % 2:                                   # circular wrap to even size
        y = jnp.concatenate([y, y[:, :1]], axis=1)
    if Wout % 2:
        y = jnp.concatenate([y, y[:, :, :1]], axis=2)
    H2, W2 = y.shape[1] // 2, y.shape[2] // 2
    S = H2 * W2
    comps = [y[:, i::2, j::2, :].reshape(N, S, CP) for i in (0, 1) for j in (0, 1)]

    # TODO(synk): the reference's learned LPS logits network
    # (get_logits_model('LPSLogitLayers')) is undefined in the provided source;
    # max-L2-norm polyphase selection (APS) is used as a stand-in.
    out = pl.pallas_call(
        partial(_bn_lrelu_lps_kernel, alpha=LRELU_ALPHA),
        grid=(N,),
        in_specs=[pl.BlockSpec((1, S, CP), lambda n: (n, 0, 0))] * 4
        + [pl.BlockSpec((1, CP), lambda n: (0, 0))] * 2,
        out_specs=pl.BlockSpec((1, S, CP), lambda n: (n, 0, 0)),
        out_shape=jax.ShapeDtypeStruct((N, S, CP), jnp.float32),
        compiler_params=_mosaic_params(dimension_semantics=("parallel",)),
    )(*comps, scale, shift)

    return out.reshape(N, H2, W2, CP)[..., :Cout]


def head(x, params):
    N, Hf, Wf, C = x.shape
    S = Hf * Wf
    D = params["fc1_wT"].shape[1]
    xf = x.reshape(N, S, C)
    return pl.pallas_call(
        partial(_head_kernel, ln_eps=LN_EPS, alpha=LRELU_ALPHA),
        out_shape=jax.ShapeDtypeStruct((N, D), jnp.float32),
        grid=(1,),
        in_specs=[
            pl.BlockSpec((N, S, C), lambda i: (0, 0, 0)),
            pl.BlockSpec((C, D), lambda i: (0, 0)),
            pl.BlockSpec((1, D), lambda i: (0, 0)),
            pl.BlockSpec((1, C), lambda i: (0, 0)),
            pl.BlockSpec((1, C), lambda i: (0, 0)),
            pl.BlockSpec((C, D), lambda i: (0, 0)),
            pl.BlockSpec((1, D), lambda i: (0, 0)),
        ],
        out_specs=pl.BlockSpec((N, D), lambda i: (0, 0)),
    )(xf, params["fc1_wT"], params["fc1_b"], params["ln_w"], params["ln_b"],
      params["fc2_wT"], params["fc2_b"])


# ----------------------------------------------------------------------------
# Forward
# ----------------------------------------------------------------------------

def klein4_2fc_forward(x_nchw, params):
    x = jnp.transpose(x_nchw, (0, 2, 3, 1)).astype(jnp.float32)  # NCHW -> NHWC
    for lp in params["layers"]:
        # KleinOneLayer.k1 (KleinFilters): conv(2k+1, circ pad 1) + BN + LeakyReLU + LPS
        x = conv_bn_lrelu_lps(x, lp["klein"], padding=1)
        # KleinOneLayer.conv1 (pruned 3x3 circ) + BN + LeakyReLU + LPS
        x = conv_bn_lrelu_lps(x, lp["conv"], padding=1)
    return head(x, params)


# ----------------------------------------------------------------------------
if __name__ == "__main__":
    key = jax.random.PRNGKey(0)
    pkey, xkey = jax.random.split(key)
    params = build_params(pkey)

    # Smallest convenient input: batch=2, 1 channel, 36x36 (spatial must survive
    # two 7x7/pad-1 convs interleaved with 4x total downsampling).
    x = jax.random.normal(xkey, (2, 1, 36, 36), jnp.float32)

    out = klein4_2fc_forward(x, params)
    out = jax.block_until_ready(out)

    assert out.shape == (2, DIMENSIONS), out.shape
    assert bool(jnp.all(jnp.isfinite(out)))
    # rows are L2-normalized
    assert bool(jnp.allclose(jnp.linalg.norm(out, axis=1), 1.0, atol=1e-4))
    print("KERNEL_OK")
</pallas_src>

<mosaic_0001>
module attributes {stable_mosaic.version = 11 : i64} {
  func.func @_gemm_stats_kernel(%arg0: i32, %arg1: memref<512x128xbf16, #tpu.memory_space<vmem>>, %arg2: memref<128x128xbf16, #tpu.memory_space<vmem>>, %arg3: memref<1x128xf32, #tpu.memory_space<vmem>>, %arg4: memref<512x128xf32, #tpu.memory_space<vmem>>, %arg5: memref<1x1x128xf32, #tpu.memory_space<vmem>>, %arg6: memref<1x1x128xf32, #tpu.memory_space<vmem>>) attributes {dimension_semantics = [#tpu.dimension_semantics<parallel>], iteration_bounds = array<i64: 4>, scalar_prefetch = 0 : i64, scratch_operands = 0 : i64, tpu.core_type = #tpu.core_type<tc>, window_params = [{transform_indices = @transform_0, window_bounds = array<i64: 512, 128>}, {pipeline_mode = #tpu.pipeline_mode<synchronous>, transform_indices = @transform_1, window_bounds = array<i64: 128, 128>}, {pipeline_mode = #tpu.pipeline_mode<synchronous>, transform_indices = @transform_2, window_bounds = array<i64: 1, 128>}, {transform_indices = @transform_3, window_bounds = array<i64: 512, 128>}, {transform_indices = @transform_4, window_bounds = array<i64: 1, 1, 128>}, {transform_indices = @transform_5, window_bounds = array<i64: 1, 1, 128>}]} {
    %c0 = arith.constant 0 : index
    %c0_0 = arith.constant 0 : index
    %0 = vector.load %arg1[%c0, %c0_0] : memref<512x128xbf16, #tpu.memory_space<vmem>>, vector<512x128xbf16>
    %c0_1 = arith.constant 0 : index
    %c0_2 = arith.constant 0 : index
    %1 = vector.load %arg2[%c0_1, %c0_2] : memref<128x128xbf16, #tpu.memory_space<vmem>>, vector<128x128xbf16>
    %cst = arith.constant dense<0.000000e+00> : vector<512x128xf32>
    %2 = tpu.matmul %0, %1, %cst {dimension_numbers = #tpu.dot_dimension_numbers<[1], [0], [0], [1], [0, 0, 1, 1], [], []>} : vector<512x128xbf16>, vector<128x128xbf16>, vector<512x128xf32> -> vector<512x128xf32>
    %c0_3 = arith.constant 0 : index
    %c0_4 = arith.constant 0 : index
    %3 = vector.load %arg3[%c0_3, %c0_4] : memref<1x128xf32, #tpu.memory_space<vmem>>, vector<1x128xf32>
    %4 = vector.broadcast %3 : vector<1x128xf32> to vector<512x128xf32>
    %5 = arith.addf %2, %4 : vector<512x128xf32>
    %c0_5 = arith.constant 0 : index
    %c0_6 = arith.constant 0 : index
    %6 = vector.load %arg4[%c0_5, %c0_6] : memref<512x128xf32, #tpu.memory_space<vmem>>, vector<512x128xf32>
    tpu.vector_store %arg4[%c0_5, %c0_6], %5 {strides = array<i32>} : memref<512x128xf32, #tpu.memory_space<vmem>>, vector<512x128xf32>,
    %cst_7 = arith.constant dense<0.000000e+00> : vector<128xf32>
    %7 = vector.multi_reduction <add>, %5, %cst_7 [0] : vector<512x128xf32> to vector<128xf32>
    %8 = vector.shape_cast %7 : vector<128xf32> to vector<1x128xf32>
    %9 = vector.shape_cast %8 : vector<1x128xf32> to vector<1x1x128xf32>
    %c0_8 = arith.constant 0 : index
    %c0_9 = arith.constant 0 : index
    %c0_10 = arith.constant 0 : index
    %10 = vector.load %arg5[%c0_8, %c0_9, %c0_10] : memref<1x1x128xf32, #tpu.memory_space<vmem>>, vector<1x1x128xf32>
    tpu.vector_store %arg5[%c0_8, %c0_9, %c0_10], %9 {strides = array<i32>} : memref<1x1x128xf32, #tpu.memory_space<vmem>>, vector<1x1x128xf32>,
    %11 = arith.mulf %5, %5 : vector<512x128xf32>
    %cst_11 = arith.constant dense<0.000000e+00> : vector<128xf32>
    %12 = vector.multi_reduction <add>, %11, %cst_11 [0] : vector<512x128xf32> to vector<128xf32>
    %13 = vector.shape_cast %12 : vector<128xf32> to vector<1x128xf32>
    %14 = vector.shape_cast %13 : vector<1x128xf32> to vector<1x1x128xf32>
    %c0_12 = arith.constant 0 : index
    %c0_13 = arith.constant 0 : index
    %c0_14 = arith.constant 0 : index
    %15 = vector.load %arg6[%c0_12, %c0_13, %c0_14] : memref<1x1x128xf32, #tpu.memory_space<vmem>>, vector<1x1x128xf32>
    tpu.vector_store %arg6[%c0_12, %c0_13, %c0_14], %14 {strides = array<i32>} : memref<1x1x128xf32, #tpu.memory_space<vmem>>, vector<1x1x128xf32>,
    return
  }
  func.func @transform_0(%arg0: i32) -> (i32, i32) {
    %c0_i32 = arith.constant 0 : i32
    %c0_i32_0 = arith.constant 0 : i32
    return %arg0, %c0_i32 : i32, i32
  }
  func.func @transform_1(%arg0: i32) -> (i32, i32) {
    %c0_i32 = arith.constant 0 : i32
    %c0_i32_0 = arith.constant 0 : i32
    %c0_i32_1 = arith.constant 0 : i32
    return %c0_i32, %c0_i32_0 : i32, i32
  }
  func.func @transform_2(%arg0: i32) -> (i32, i32) {
    %c0_i32 = arith.constant 0 : i32
    %c0_i32_0 = arith.constant 0 : i32
    %c0_i32_1 = arith.constant 0 : i32
    return %c0_i32, %c0_i32_0 : i32, i32
  }
  func.func @transform_3(%arg0: i32) -> (i32, i32) {
    %c0_i32 = arith.constant 0 : i32
    %c0_i32_0 = arith.constant 0 : i32
    return %arg0, %c0_i32 : i32, i32
  }
  func.func @transform_4(%arg0: i32) -> (i32, i32, i32) {
    %c0_i32 = arith.constant 0 : i32
    %c0_i32_0 = arith.constant 0 : i32
    %c0_i32_1 = arith.constant 0 : i32
    return %arg0, %c0_i32, %c0_i32_0 : i32, i32, i32
  }
  func.func @transform_5(%arg0: i32) -> (i32, i32, i32) {
    %c0_i32 = arith.constant 0 : i32
    %c0_i32_0 = arith.constant 0 : i32
    %c0_i32_1 = arith.constant 0 : i32
    return %arg0, %c0_i32, %c0_i32_0 : i32, i32, i32
  }
}

</mosaic_0001>

<bundles_post_ra>
// kernel: tpu_custom_call.1
= control target key start
LH: loop header
LB: loop body
LE: loop exit
PB: predicated region body
PF: predicated region fallthrough
CT: control target
= control target key end

     0   :  { %11 = vsyncpa [#allocation3], 0  ;;  %s2486_s0 = inlined_call_operand.hbm [shape: bf16[2048,128], index: 0, kind: input, shape index: {}]   ;;  %s2487_s1 = inlined_call_operand.hbm [shape: bf16[128,128], index: 1, kind: input, shape index: {}]   ;;  %s2488_s2 = inlined_call_operand.vmem [shape: f32[1,128], index: 2, kind: input, shape index: {}]   ;;  %s2489_s3 = inlined_call_operand.hbm [shape: f32[2048,128], index: 3, kind: output, shape index: {0}]   ;;  %s2490_s4 = inlined_call_operand.hbm [shape: f32[4,1,128], index: 4, kind: output, shape index: {1}]   ;;  %s2491_s5 = inlined_call_operand.hbm [shape: f32[4,1,128], index: 5, kind: output, shape index: {2}]  }
   0x1   :  { %13 = vsyncpa [#allocation3 + $0x1], 0 }
   0x2   :  { %14 = vsyncpa [#allocation6], 0 }
   0x3   :  { %15 = vsyncpa [#allocation4], 0 }
   0x4   :  { %17 = vsyncpa [#allocation4 + $0x1], 0 }
   0x5   :  { %18 = vsyncpa [#allocation9], 0 }
   0x6   :  { %20 = vsyncpa [#allocation9 + $0x1], 0  ;;  %s1872_s18 = smov 0   ;;  %s1874_s19 = smov 0  }
   0x7   :  { %s1876_s20 = smov 0   ;;  %s1878_s21 = smov 0  }
   0x8 LB: > { %s1893_s22 = sadd.s32 4294967295, %s1831_s21   ;;  %s2493_s23 = sadd.s32 4294967294, %s1831_s21   ;;  %s1831_s21 = sphi %s1878_s21, %s2516_s21   ;;  %s1827_s20 = sphi %s1876_s20, %s2515_s20   ;;  %s1823_s19 = sphi %s1874_s19, %s2514_s19   ;;  %s1819_s18 = sphi %s1872_s18, %s2513_s18  }
   0x9   : > { %p46_p0 = scmp.ne.s32.totalorder %s1823_s19, %s1819_s18  ;;  %p2492_p1 = scmp.eq.s32.totalorder %s1893_s22, 0 }
   0xa   : > { %p118_p3 = scmp.eq.s32.totalorder %s2493_s23, 3  ;;  %p1346_p5 = scmp.ge.s32.totalorder %s1831_s21, 1 }
   0xb   : > { %p1904_p4 = por %p2492_p1, %p46_p0  ;;  %p177_p7 = scmp.lt.s32.totalorder %s1831_s21, 5 }
   0xc   : > { %p1909_p6 = por %p118_p3, %p46_p0  ;;  %s1833_s27 = smov [#allocation5]  }
   0xd   : > { %s2498_s24 = scalar_select %p1904_p4, 1, 0 }
   0xe   : > { %s2499_s25 = scalar_select %p1909_p6, 1, 0 }
   0xf   : > { %p1914_p8 = pnand %p1346_p5, %p177_p7  ;;  %s189_s28 = sshll.u32 %s1833_s27, 4  ;;  %s190_s28 = int_to_ptr.vmem [resolvable:$true] %s189_s28 }
  0x10   : > { %s1927_s30 = sadd.s32 1, %s1831_s21   ;;  %s33_s6 = sadd.s32 1, %s1827_s20 }
  0x11   : > { %s2500_s26 = scalar_select %p1914_p8, 1, 0 }
  0x12   : > { %p1554_p9 = pneg %p1914_p8  ;;  %s30_s7 = ssub.s32 %s1831_s21, %s1927_s30 }
  0x13   : > { %s1664_s8 = scalar_lea.vmem %s190_s28, 1024  ;;  %p1672_p3 = scmp.lt.s32.totalorder %s190_s28, %s190_s28 }
  0x14   : > { %p1922_p10 = pnand %p1554_p9, %p2492_p1  ;;  %p1665_p12 = scmp.ne.s32.totalorder %s190_s28, %s1664_s8 }
  0x15   : > { %p1673_p5 = scmp.lt.s32.totalorder %s1664_s8, %s1664_s8 }
  0x16   : > { %p1655_p11 = pneg %p1922_p10 }
  0x17   : > { %p1674_p7 = por %p1673_p5, %p1672_p3 }
  0x18   : > { %p1667_p13 = pnand %p1665_p12, %p1655_p11 }
  0x1a   : > { %p1668_p0 = pneg %p1667_p13 }
  0x1c   : > { %p1675_p2 = pnand %p1674_p7, %p1668_p0 }
  0x1e   : > { %1678 = shalt.err (!%p1675_p2)
}
  0x1f   : > { %s2494_s9 = smov 64   ;;  %s1835_s10 = smov 4  }
  0x20   : > { %1557 = dma.hbm_to_vmem [thread:$0]  (!%p1922_p10), %s2487_s1, 1024, %s190_s28, [#allocation6], %s2494_s9, %s2494_s9, %s1835_s10  }
  0x21   : > { %p31_p2 = scmp.eq.s32.totalorder %s30_s7, 0  ;;  %p40_p9 = scmp.ne.s32.totalorder %s1827_s20, %s1823_s19 }
  0x22   : > { %p41_p11 = scmp.eq.s32.totalorder %s1831_s21, 0  ;;  %p1573_p12 = scmp.lt.s32.totalorder %s1831_s21, 4 }
  0x23   : > { %s1947_s13 = scalar_select %p31_p2, %s1827_s20, %s33_s6  }
  0x24   : > { %p42_p13 = por %p41_p11, %p40_p9  ;;  %p2502_p0 = scmp.eq.s32.totalorder %s1893_s22, 3 }
  0x25   : > { %s206_s15 = sand.u32 1, %s1827_s20   ;;  %s1404_s16 = sshll.u32 %s1831_s21, 12 }
  0x26   : > { %p1951_p3 = por %p2502_p0, %p40_p9  ;;  %s1349_s17 = sshll.u32 %s206_s15, 8 }
  0x27   : > { %s1960_s8 = scalar_lea.hbm %s2486_s0, %s1404_s16  ;;  %s210_s28 = scalar_lea.vmem [#allocation2], %s1349_s17 }
  0x28   : > { %s2503_s14 = scalar_select %p1951_p3, 1, 0 }
  0x29   : > { %s217_s6 = sshll.u32 %s210_s28, 4  ;;  %p1962_p10 = pnand %p1573_p12, %p42_p13  ;;  %s1966_s6 = int_to_ptr.vmem [resolvable:$true] %s217_s6 }
  0x2a   : > { %s1968_s11 = scalar_lea.sflag [#allocation3], %s206_s15  ;;  %s1679_s12 = scalar_lea.hbm %s1960_s8, 4096 }
  0x2b   : > { %p1680_p5 = scmp.ne.s32.totalorder %s1960_s8, %s1679_s12  ;;  %p1681_p7 = pneg %p1962_p10 }
  0x2c   : > { %s1684_s17 = scalar_lea.hbm %s2486_s0, 16384  ;;  %p1685_p11 = scmp.lt.s32.totalorder %s1960_s8, %s2486_s0 }
  0x2d   : > { %p1682_p2 = pnand %p1681_p7, %p1680_p5  ;;  %p1686_p12 = scmp.lt.s32.totalorder %s1684_s17, %s1679_s12 }
  0x2f   : > { %p1683_p9 = pneg %p1682_p2  ;;  %p1687_p13 = por %p1686_p12, %p1685_p11 }
  0x31   : > { %p1688_p0 = pnand %p1687_p13, %p1683_p9 }
  0x33   : > { %1691 = shalt.err (!%p1688_p0)
}
  0x34   : > { %s1692_s15 = scalar_lea.vmem %s1966_s6, 4096  ;;  %s1836_s23 = smov [#allocation2]  }
  0x35   : > { %p1693_p1 = scmp.ne.s32.totalorder %s1966_s6, %s1692_s15  ;;  %s1697_s9 = sshll.u32 %s1836_s23, 4  ;;  %s1698_s9 = int_to_ptr.vmem [resolvable:$false] %s1697_s9 }
  0x36   : > { %s1699_s16 = scalar_lea.vmem %s1698_s9, 8192  ;;  %p1700_p2 = scmp.lt.s32.totalorder %s1966_s6, %s1698_s9 }
  0x37   : > { %p1695_p6 = pnand %p1693_p1, %p1681_p7  ;;  %p1701_p3 = scmp.lt.s32.totalorder %s1699_s16, %s1692_s15 }
  0x39   : > { %p1696_p5 = pneg %p1695_p6  ;;  %p1702_p4 = por %p1701_p3, %p1700_p2 }
  0x3b   : > { %p1703_p8 = pnand %p1702_p4, %p1696_p5 }
  0x3d   : > { %1706 = shalt.err (!%p1703_p8)
}
  0x3e   : > { %s2505_s12 = smov 64   ;;  %p2506_p1 = scmp.ne.s32.totalorder %s2500_s26, 0 }
  0x3f   : > { %1561 = dma.hbm_to_vmem [thread:$0]  (!%p1962_p10), %s1960_s8, 4096, %s1966_s6, %s1968_s11, %s2505_s12, %s2505_s12, %s1835_s10  }
  0x40   : > { %229 = sbr.rel (%p2506_p1) target bundleno = 489 (0x1e9), region = 32  ;;  %s1995_s23 = sand.u32 (!%p2506_p1), 1, %s1823_s19  }
  0x41   : > { %s1353_s9 = sshll.u32 (!%p2506_p1), %s1995_s23, 8  ;;  %s232_s27 = scalar_lea.sflag (!%p2506_p1), [#allocation3], %s1995_s23 }
  0x42   : > { %s1999_s17 = scalar_lea.vmem (!%p2506_p1), [#allocation2], %s1353_s9  ;;  %p2507_p4 = scmp.ne.s32.totalorder (!%p2506_p1), %s2498_s24, 0 }
  0x45   : > { %1802 = dma.done.wait (%p2507_p4), %s232_s27, 4096  }
  0x46   : > { %1804 = vsyncadd (%p2507_p4), %s232_s27, 4294963200  ;;  %p2508_p6 = scmp.eq.s32.totalorder %s1893_s22, 0 }
  0x48   : > { %1806 = dma.done.wait (%p2508_p6), [#allocation6], 1024   ;;  %p2509_p8 = pmov %p2508_p6 }
  0x49   : > { %v1613_v0 = vld [vmem:[#allocation5 + $0x38] sm:$0xff]   ;;  %v1614_v1 = vld [vmem:[#allocation5 + $0x30] sm:$0xff]   ;;  %v1615_v2 = vld [vmem:[#allocation5 + $0x28] sm:$0xff]   ;;  %s1355_s24 = sshll.u32 %s1995_s23, 9  ;;  %s1405_s6 = sshll.u32 %s1893_s22, 13 }
  0x4a   : > { %1808 = vsyncadd (%p2509_p8), [#allocation6], 4294966272  ;;  %1446 = vmatprep.subr.bf16.mxu0 %v1613_v0  ;;  %1526 = vmatprep.subr.bf16.mxu1 %v1613_v0  ;;  %v1616_v3 = vld [vmem:[#allocation5 + $0x20] sm:$0xff]   ;;  %v1617_v5 = vld [vmem:[#allocation5 + $0x18] sm:$0xff]   ;;  %s2051_s8 = scalar_lea.vmem [#allocation7], %s1355_s24  ;;  %s2270_s28 = scalar_lea.hbm %s2489_s3, %s1405_s6 }
  0x4b   : > { %1447 = vmatpush3.bf16.msra.mxu0 %v1613_v0  ;;  %1534 = vmatpush3.bf16.msra.mxu1 %v1613_v0  ;;  %v1621_v4 = vld [vmem:[%s1999_s17] sm:$0xff]   ;;  %v1618_v6 = vld [vmem:[#allocation5 + $0x10] sm:$0xff]   ;;  %v1619_v7 = vld [vmem:[#allocation5 + $0x8] sm:$0xff]   ;;  %s1183_s7 = sshll.u32 %s2051_s8, 4  ;;  %s1162_s15 = scalar_lea.sflag [#allocation4], %s1995_s23  ;;  %s2272_s7 = int_to_ptr.vmem [resolvable:$true] %s1183_s7 }
  0x4c   : > { %1448 = vmatprep.subr.bf16.mxu0 %v1614_v1  ;;  %1527 = vmatprep.subr.bf16.mxu1 %v1614_v1  ;;  %v1620_v8 = vld [vmem:[#allocation5] sm:$0xff]   ;;  %v1622_v10 = vld [vmem:[%s1999_s17 + $0x8] sm:$0xff]   ;;  %v1623_v11 = vld [vmem:[%s1999_s17 + $0x10] sm:$0xff]   ;;  %s1707_s16 = scalar_lea.vmem %s2272_s7, 8192  ;;  %p2510_p10 = scmp.ne.s32.totalorder %s2503_s14, 0 }
  0x4d   : > { %1462 = vmatprep.mubr.bf16.mxu0 %v1621_v4  ;;  %v1637_v9 = vld [vmem:[%s1999_s17 + $0x80] sm:$0xff]   ;;  %v1638_v12 = vld [vmem:[%s1999_s17 + $0x88] sm:$0xff]   ;;  %v1639_v13 = vld [vmem:[%s1999_s17 + $0x90] sm:$0xff]   ;;  %p1708_p3 = scmp.ne.s32.totalorder %s2272_s7, %s1707_s16  ;;  %s1837_s12 = smov [#allocation7]  }
  0x4e   : > { %1494 = vmatprep.mubr.bf16.mxu1 %v1637_v9  ;;  %v1624_v14 = vld [vmem:[%s1999_s17 + $0x18] sm:$0xff]   ;;  %v1625_v15 = vld [vmem:[%s1999_s17 + $0x20] sm:$0xff]   ;;  %v1626_v18 = vld [vmem:[%s1999_s17 + $0x28] sm:$0xff]   ;;  %s1711_s9 = sshll.u32 %s1837_s12, 4  ;;  %s1712_s9 = int_to_ptr.vmem [resolvable:$false] %s1711_s9 }
  0x4f   : > { %1449 = vmatpush3.bf16.msra.mxu0 %v1614_v1  ;;  %1535 = vmatpush3.bf16.msra.mxu1 %v1614_v1  ;;  %v1640_v16 = vld [vmem:[%s1999_s17 + $0x98] sm:$0xff]   ;;  %v1641_v17 = vld [vmem:[%s1999_s17 + $0xa0] sm:$0xff]   ;;  %v1642_v19 = vld [vmem:[%s1999_s17 + $0xa8] sm:$0xff]   ;;  %p1709_p7 = pnand %p1708_p3, %p2510_p10  ;;  %s1713_s27 = scalar_lea.vmem %s1712_s9, 16384 }
  0x50   : > { %1450 = vmatprep.subr.bf16.mxu0 %v1615_v2  ;;  %1528 = vmatprep.subr.bf16.mxu1 %v1615_v2  ;;  %v1627_v20 = vld [vmem:[%s1999_s17 + $0x30] sm:$0xff]   ;;  %v1628_v22 = vld [vmem:[%s1999_s17 + $0x38] sm:$0xff]   ;;  %v1629_v24 = vld [vmem:[%s1999_s17 + $0x40] sm:$0xff]   ;;  %p1714_p11 = scmp.lt.s32.totalorder %s2272_s7, %s1712_s9  ;;  %p1715_p12 = scmp.lt.s32.totalorder %s1713_s27, %s1707_s16 }
  0x51   : > { %v1643_v21 = vld [vmem:[%s1999_s17 + $0xb0] sm:$0xff]   ;;  %v1644_v23 = vld [vmem:[%s1999_s17 + $0xb8] sm:$0xff]   ;;  %v1645_v25 = vld [vmem:[%s1999_s17 + $0xc0] sm:$0xff]   ;;  %p1710_p9 = pneg %p1709_p7 }
  0x52   : > { %v1630_v26 = vld [vmem:[%s1999_s17 + $0x48] sm:$0xff]   ;;  %v1631_v28 = vld [vmem:[%s1999_s17 + $0x50] sm:$0xff]   ;;  %v1632_v30 = vld [vmem:[%s1999_s17 + $0x58] sm:$0xff]   ;;  %p1716_p13 = por %p1715_p12, %p1714_p11 }
  0x53   : > { %1451 = vmatpush3.bf16.msra.mxu0 %v1615_v2  ;;  %1536 = vmatpush3.bf16.msra.mxu1 %v1615_v2  ;;  %v1646_v27 = vld [vmem:[%s1999_s17 + $0xc8] sm:$0xff]   ;;  %v1647_v29 = vld [vmem:[%s1999_s17 + $0xd0] sm:$0xff]   ;;  %v1648_v31 = vld [vmem:[%s1999_s17 + $0xd8] sm:$0xff]  }
  0x54   : > { %1452 = vmatprep.subr.bf16.mxu0 %v1616_v3  ;;  %1529 = vmatprep.subr.bf16.mxu1 %v1616_v3  ;;  %v1633_v32 = vld [vmem:[%s1999_s17 + $0x60] sm:$0xff]   ;;  %v1634_v34 = vld [vmem:[%s1999_s17 + $0x68] sm:$0xff]   ;;  %v1635_v36 = vld [vmem:[%s1999_s17 + $0x70] sm:$0xff]   ;;  %p1717_p0 = pnand %p1716_p13, %p1710_p9 }
  0x55   : > { %v1649_v33 = vld [vmem:[%s1999_s17 + $0xe0] sm:$0xff]   ;;  %v1650_v35 = vld [vmem:[%s1999_s17 + $0xe8] sm:$0xff]   ;;  %v1651_v37 = vld [vmem:[%s1999_s17 + $0xf0] sm:$0xff]  }
  0x56   : > { %v1636_v38 = vld [vmem:[%s1999_s17 + $0x78] sm:$0xff]   ;;  %v2045_v40 = vld [vmem:[%s2488_s2] ss:$0 sm:$0xff] }
  0x57   : > { %1453 = vmatpush3.bf16.msra.mxu0 %v1616_v3  ;;  %1537 = vmatpush3.bf16.msra.mxu1 %v1616_v3  ;;  %v1652_v39 = vld [vmem:[%s1999_s17 + $0xf8] sm:$0xff]  }
  0x58   : > { %1454 = vmatprep.subr.bf16.mxu0 %v1617_v5  ;;  %1530 = vmatprep.subr.bf16.mxu1 %v1617_v5 }
  0x5b   : > { %1455 = vmatpush3.bf16.msra.mxu0 %v1617_v5  ;;  %1538 = vmatpush3.bf16.msra.mxu1 %v1617_v5 }
  0x5c   : > { %1456 = vmatprep.subr.bf16.mxu0 %v1618_v6  ;;  %1531 = vmatprep.subr.bf16.mxu1 %v1618_v6 }
  0x5f   : > { %1457 = vmatpush3.bf16.msra.mxu0 %v1618_v6  ;;  %1539 = vmatpush3.bf16.msra.mxu1 %v1618_v6 }
  0x60   : > { %1458 = vmatprep.subr.bf16.mxu0 %v1619_v7  ;;  %1532 = vmatprep.subr.bf16.mxu1 %v1619_v7 }
  0x63   : > { %1459 = vmatpush3.bf16.msra.mxu0 %v1619_v7  ;;  %1540 = vmatpush3.bf16.msra.mxu1 %v1619_v7 }
  0x64   : > { %1460 = vmatprep.subr.bf16.mxu0 %v1620_v8  ;;  %1533 = vmatprep.subr.bf16.mxu1 %v1620_v8 }
  0x67   : > { %1461 = vmatpush3.bf16.msra.mxu0 %v1620_v8  ;;  %1541 = vmatpush3.bf16.msra.mxu1 %v1620_v8 }
  0x6a   : > { %1463 = vmatmul.mubr.bf16.vlgmr.msra.gmra.mxu0 %v1622_v10  ;;  %1495 = vmatmul.mubr.bf16.vlgmr.msra.gmra.mxu1 %v1638_v12 }
  0x6b   : > { %1466 = vmatprep.mubr.bf16.mxu0 %v1623_v11  ;;  %1498 = vmatprep.mubr.bf16.mxu1 %v1639_v13 }
  0x72   : > { %1467 = vmatmul.mubr.bf16.gmra.mxu0 %v1624_v14  ;;  %1499 = vmatmul.mubr.bf16.gmra.mxu1 %v1640_v16 }
  0x73   : > { %1470 = vmatprep.mubr.bf16.mxu0 %v1625_v15  ;;  %1502 = vmatprep.mubr.bf16.mxu1 %v1641_v17 }
  0x7a   : > { %1471 = vmatmul.mubr.bf16.gmra.mxu0 %v1626_v18  ;;  %1503 = vmatmul.mubr.bf16.gmra.mxu1 %v1642_v19 }
  0x7b   : > { %1474 = vmatprep.mubr.bf16.mxu0 %v1627_v20  ;;  %1506 = vmatprep.mubr.bf16.mxu1 %v1643_v21 }
  0x82   : > { %1475 = vmatmul.mubr.bf16.gmra.mxu0 %v1628_v22  ;;  %1507 = vmatmul.mubr.bf16.gmra.mxu1 %v1644_v23 }
  0x83   : > { %1478 = vmatprep.mubr.bf16.mxu0 %v1629_v24  ;;  %1510 = vmatprep.mubr.bf16.mxu1 %v1645_v25 }
  0x8a   : > { %1479 = vmatmul.mubr.bf16.gmra.mxu0 %v1630_v26  ;;  %1511 = vmatmul.mubr.bf16.gmra.mxu1 %v1646_v27 }
  0x8b   : > { %1482 = vmatprep.mubr.bf16.mxu0 %v1631_v28  ;;  %1514 = vmatprep.mubr.bf16.mxu1 %v1647_v29 }
  0x92   : > { %1483 = vmatmul.mubr.bf16.gmra.mxu0 %v1632_v30  ;;  %1515 = vmatmul.mubr.bf16.gmra.mxu1 %v1648_v31 }
  0x93   : > { %1486 = vmatprep.mubr.bf16.mxu0 %v1633_v32  ;;  %1518 = vmatprep.mubr.bf16.mxu1 %v1649_v33 }
  0x9a   : > { %1487 = vmatmul.mubr.bf16.gmra.mxu0 %v1634_v34  ;;  %1519 = vmatmul.mubr.bf16.gmra.mxu1 %v1650_v35 }
  0x9b   : > { %1490 = vmatprep.mubr.bf16.mxu0 %v1635_v36  ;;  %1522 = vmatprep.mubr.bf16.mxu1 %v1651_v37 }
  0xa2   : > { %1491 = vmatmul.mubr.bf16.gmra.mxu0 %v1636_v38  ;;  %1523 = vmatmul.mubr.bf16.gmra.mxu1 %v1652_v39 }
 0x12a   : > { %v1464_v41 = vpop.f32.mrf.mxu0  ;;  %v1496_v42 = vpop.f32.mrf.mxu1 }
 0x12b   : > { %v647_v43 = vadd.f32 %v1464_v41, %v2045_v40  ;;  %v2049_v44 = vadd.f32 %v1496_v42, %v2045_v40 }
 0x12c   : > { %v638_v45 = vpop.f32.mrf.mxu0  ;;  %v766_v46 = vpop.f32.mrf.mxu1 }
 0x12d   : > { %895 = vst [vmem:[%s2051_s8 + $0x10] sm:$0xff] %v647_v43  ;;  %v639_v47 = vadd.f32 %v2045_v40, %v638_v45  ;;  %927 = vst [vmem:[%s2051_s8 + $0x110] sm:$0xff] %v2049_v44  ;;  %v2058_v48 = vadd.f32 %v2045_v40, %v766_v46  ;;  %v1029_v2 = vmul.f32 %v647_v43, %v647_v43 }
 0x12e   : > { %v1465_v49 = vpop.f32.mrf.mxu0  ;;  %v1497_v50 = vpop.f32.mrf.mxu1 }
 0x12f   : > { %893 = vst [vmem:[%s2051_s8] sm:$0xff] %v639_v47  ;;  %v650_v51 = vadd.f32 %v1465_v49, %v2045_v40  ;;  %925 = vst [vmem:[%s2051_s8 + $0x100] sm:$0xff] %v2058_v48  ;;  %v2065_v52 = vadd.f32 %v1497_v50, %v2045_v40  ;;  %v1027_v59 = vmul.f32 %v639_v47, %v639_v47 }
 0x130   : > { %v641_v53 = vpop.f32.mrf.mxu0  ;;  %v769_v54 = vpop.f32.mrf.mxu1 }
 0x131   : > { %896 = vst [vmem:[%s2051_s8 + $0x18] sm:$0xff] %v650_v51  ;;  %v642_v55 = vadd.f32 %v2045_v40, %v641_v53  ;;  %928 = vst [vmem:[%s2051_s8 + $0x118] sm:$0xff] %v2065_v52  ;;  %v2072_v56 = vadd.f32 %v2045_v40, %v769_v54  ;;  %v1030_v9 = vmul.f32 %v650_v51, %v650_v51 }
 0x132   : > { %v1468_v57 = vpop.f32.mrf.mxu0  ;;  %v1500_v58 = vpop.f32.mrf.mxu1 }
 0x133   : > { %894 = vst [vmem:[%s2051_s8 + $0x8] sm:$0xff] %v642_v55  ;;  %v957_v60 = vadd.f32 %v642_v55, %v639_v47  ;;  %v1028_v61 = vmul.f32 %v642_v55, %v642_v55  ;;  %v663_v62 = vadd.f32 %v1468_v57, %v2045_v40  ;;  %926 = vst [vmem:[%s2051_s8 + $0x108] sm:$0xff] %v2072_v56 }
 0x134   : > { %v654_v63 = vpop.f32.mrf.mxu0  ;;  %v2079_v0 = vadd.f32 %v1500_v58, %v2045_v40  ;;  %v782_v1 = vpop.f32.mrf.mxu1 }
 0x135   : > { %v958_v3 = vadd.f32 %v957_v60, %v647_v43  ;;  %v1091_v4 = vadd.f32 %v1028_v61, %v1027_v59  ;;  %899 = vst [vmem:[%s2051_s8 + $0x30] sm:$0xff] %v663_v62  ;;  %v655_v5 = vadd.f32 %v2045_v40, %v654_v63  ;;  %v2086_v7 = vadd.f32 %v2045_v40, %v782_v1 }
 0x136   : > { %v1469_v6 = vpop.f32.mrf.mxu0  ;;  %931 = vst [vmem:[%s2051_s8 + $0x130] sm:$0xff] %v2079_v0  ;;  %v1501_v8 = vpop.f32.mrf.mxu1  ;;  %v1033_v30 = vmul.f32 %v663_v62, %v663_v62 }
 0x137   : > { %v1092_v10 = vadd.f32 %v1091_v4, %v1029_v2  ;;  %897 = vst [vmem:[%s2051_s8 + $0x20] sm:$0xff] %v655_v5  ;;  %v959_v11 = vadd.f32 %v958_v3, %v650_v51  ;;  %v666_v12 = vadd.f32 %v1469_v6, %v2045_v40  ;;  %929 = vst [vmem:[%s2051_s8 + $0x120] sm:$0xff] %v2086_v7 }
 0x138   : > { %v657_v13 = vpop.f32.mrf.mxu0  ;;  %v2093_v14 = vadd.f32 %v1501_v8, %v2045_v40  ;;  %v785_v15 = vpop.f32.mrf.mxu1  ;;  %v1031_v17 = vmul.f32 %v655_v5, %v655_v5 }
 0x139   : > { %v960_v16 = vadd.f32 %v959_v11, %v655_v5  ;;  %v1093_v18 = vadd.f32 %v1092_v10, %v1030_v9  ;;  %900 = vst [vmem:[%s2051_s8 + $0x38] sm:$0xff] %v666_v12  ;;  %v658_v19 = vadd.f32 %v2045_v40, %v657_v13  ;;  %v2100_v21 = vadd.f32 %v2045_v40, %v785_v15 }
 0x13a   : > { %v1472_v20 = vpop.f32.mrf.mxu0  ;;  %932 = vst [vmem:[%s2051_s8 + $0x138] sm:$0xff] %v2093_v14  ;;  %v1504_v22 = vpop.f32.mrf.mxu1  ;;  %v1034_v37 = vmul.f32 %v666_v12, %v666_v12 }
 0x13b   : > { %v1094_v23 = vadd.f32 %v1093_v18, %v1031_v17  ;;  %898 = vst [vmem:[%s2051_s8 + $0x28] sm:$0xff] %v658_v19  ;;  %v961_v24 = vadd.f32 %v960_v16, %v658_v19  ;;  %v1032_v25 = vmul.f32 %v658_v19, %v658_v19  ;;  %v679_v26 = vadd.f32 %v1472_v20, %v2045_v40 }
 0x13c   : > { %v670_v27 = vpop.f32.mrf.mxu0  ;;  %930 = vst [vmem:[%s2051_s8 + $0x128] sm:$0xff] %v2100_v21  ;;  %v2107_v28 = vadd.f32 %v1504_v22, %v2045_v40  ;;  %v798_v29 = vpop.f32.mrf.mxu1 }
 0x13d   : > { %v962_v31 = vadd.f32 %v961_v24, %v663_v62  ;;  %v1095_v32 = vadd.f32 %v1094_v23, %v1032_v25  ;;  %903 = vst [vmem:[%s2051_s8 + $0x50] sm:$0xff] %v679_v26  ;;  %v671_v33 = vadd.f32 %v2045_v40, %v670_v27  ;;  %v2114_v35 = vadd.f32 %v2045_v40, %v798_v29 }
 0x13e   : > { %v1473_v34 = vpop.f32.mrf.mxu0  ;;  %935 = vst [vmem:[%s2051_s8 + $0x150] sm:$0xff] %v2107_v28  ;;  %v1505_v36 = vpop.f32.mrf.mxu1  ;;  %v1037_v63 = vmul.f32 %v679_v26, %v679_v26 }
 0x13f   : > { %v1096_v38 = vadd.f32 %v1095_v32, %v1033_v30  ;;  %901 = vst [vmem:[%s2051_s8 + $0x40] sm:$0xff] %v671_v33  ;;  %v963_v39 = vadd.f32 %v962_v31, %v666_v12  ;;  %v682_v41 = vadd.f32 %v1473_v34, %v2045_v40  ;;  %933 = vst [vmem:[%s2051_s8 + $0x140] sm:$0xff] %v2114_v35 }
 0x140   : > { %v673_v42 = vpop.f32.mrf.mxu0  ;;  %v2121_v43 = vadd.f32 %v1505_v36, %v2045_v40  ;;  %v801_v45 = vpop.f32.mrf.mxu1  ;;  %v1035_v47 = vmul.f32 %v671_v33, %v671_v33 }
 0x141   : > { %v964_v46 = vadd.f32 %v963_v39, %v671_v33  ;;  %v1097_v49 = vadd.f32 %v1096_v38, %v1034_v37  ;;  %904 = vst [vmem:[%s2051_s8 + $0x58] sm:$0xff] %v682_v41  ;;  %v674_v50 = vadd.f32 %v2045_v40, %v673_v42  ;;  %v2128_v53 = vadd.f32 %v2045_v40, %v801_v45 }
 0x142   : > { %v1476_v51 = vpop.f32.mrf.mxu0  ;;  %936 = vst [vmem:[%s2051_s8 + $0x158] sm:$0xff] %v2121_v43  ;;  %v1508_v54 = vpop.f32.mrf.mxu1  ;;  %v1038_v8 = vmul.f32 %v682_v41, %v682_v41 }
 0x143   : > { %v1098_v55 = vadd.f32 %v1097_v49, %v1035_v47  ;;  %902 = vst [vmem:[%s2051_s8 + $0x48] sm:$0xff] %v674_v50  ;;  %v965_v57 = vadd.f32 %v964_v46, %v674_v50  ;;  %v1036_v58 = vmul.f32 %v674_v50, %v674_v50  ;;  %v695_v59 = vadd.f32 %v1476_v51, %v2045_v40 }
 0x144   : > { %v686_v60 = vpop.f32.mrf.mxu0  ;;  %934 = vst [vmem:[%s2051_s8 + $0x148] sm:$0xff] %v2128_v53  ;;  %v2135_v61 = vadd.f32 %v1508_v54, %v2045_v40  ;;  %v814_v62 = vpop.f32.mrf.mxu1 }
 0x145   : > { %v966_v1 = vadd.f32 %v965_v57, %v679_v26  ;;  %v1099_v2 = vadd.f32 %v1098_v55, %v1036_v58  ;;  %907 = vst [vmem:[%s2051_s8 + $0x70] sm:$0xff] %v695_v59  ;;  %v687_v3 = vadd.f32 %v2045_v40, %v686_v60  ;;  %v2142_v5 = vadd.f32 %v2045_v40, %v814_v62 }
 0x146   : > { %v1477_v4 = vpop.f32.mrf.mxu0  ;;  %939 = vst [vmem:[%s2051_s8 + $0x170] sm:$0xff] %v2135_v61  ;;  %v1509_v6 = vpop.f32.mrf.mxu1  ;;  %v1041_v32 = vmul.f32 %v695_v59, %v695_v59 }
 0x147   : > { %v1100_v9 = vadd.f32 %v1099_v2, %v1037_v63  ;;  %905 = vst [vmem:[%s2051_s8 + $0x60] sm:$0xff] %v687_v3  ;;  %v967_v10 = vadd.f32 %v966_v1, %v682_v41  ;;  %v698_v11 = vadd.f32 %v1477_v4, %v2045_v40  ;;  %937 = vst [vmem:[%s2051_s8 + $0x160] sm:$0xff] %v2142_v5 }
 0x148   : > { %v689_v12 = vpop.f32.mrf.mxu0  ;;  %v2149_v13 = vadd.f32 %v1509_v6, %v2045_v40  ;;  %v817_v15 = vpop.f32.mrf.mxu1  ;;  %v1039_v17 = vmul.f32 %v687_v3, %v687_v3 }
 0x149   : > { %v968_v16 = vadd.f32 %v967_v10, %v687_v3  ;;  %v1101_v18 = vadd.f32 %v1100_v9, %v1038_v8  ;;  %908 = vst [vmem:[%s2051_s8 + $0x78] sm:$0xff] %v698_v11  ;;  %v690_v19 = vadd.f32 %v2045_v40, %v689_v12  ;;  %v2156_v22 = vadd.f32 %v2045_v40, %v817_v15 }
 0x14a   : > { %v1480_v20 = vpop.f32.mrf.mxu0  ;;  %940 = vst [vmem:[%s2051_s8 + $0x178] sm:$0xff] %v2149_v13  ;;  %v1512_v23 = vpop.f32.mrf.mxu1  ;;  %v1042_v41 = vmul.f32 %v698_v11, %v698_v11 }
 0x14b   : > { %v1102_v24 = vadd.f32 %v1101_v18, %v1039_v17  ;;  %906 = vst [vmem:[%s2051_s8 + $0x68] sm:$0xff] %v690_v19  ;;  %v969_v25 = vadd.f32 %v968_v16, %v690_v19  ;;  %v1040_v26 = vmul.f32 %v690_v19, %v690_v19  ;;  %v711_v27 = vadd.f32 %v1480_v20, %v2045_v40 }
 0x14c   : > { %v702_v29 = vpop.f32.mrf.mxu0  ;;  %938 = vst [vmem:[%s2051_s8 + $0x168] sm:$0xff] %v2156_v22  ;;  %v2163_v30 = vadd.f32 %v1512_v23, %v2045_v40  ;;  %v830_v31 = vpop.f32.mrf.mxu1 }
 0x14d   : > { %v970_v33 = vadd.f32 %v969_v25, %v695_v59  ;;  %v1103_v34 = vadd.f32 %v1102_v24, %v1040_v26  ;;  %911 = vst [vmem:[%s2051_s8 + $0x90] sm:$0xff] %v711_v27  ;;  %v703_v36 = vadd.f32 %v2045_v40, %v702_v29  ;;  %v2170_v38 = vadd.f32 %v2045_v40, %v830_v31 }
 0x14e   : > { %v1481_v37 = vpop.f32.mrf.mxu0  ;;  %943 = vst [vmem:[%s2051_s8 + $0x190] sm:$0xff] %v2163_v30  ;;  %v1513_v39 = vpop.f32.mrf.mxu1  ;;  %v1045_v8 = vmul.f32 %v711_v27, %v711_v27 }
 0x14f   : > { %v1104_v42 = vadd.f32 %v1103_v34, %v1041_v32  ;;  %909 = vst [vmem:[%s2051_s8 + $0x80] sm:$0xff] %v703_v36  ;;  %v971_v45 = vadd.f32 %v970_v33, %v698_v11  ;;  %v714_v46 = vadd.f32 %v1481_v37, %v2045_v40  ;;  %941 = vst [vmem:[%s2051_s8 + $0x180] sm:$0xff] %v2170_v38 }
 0x150   : > { %v705_v47 = vpop.f32.mrf.mxu0  ;;  %v2177_v49 = vadd.f32 %v1513_v39, %v2045_v40  ;;  %v833_v50 = vpop.f32.mrf.mxu1  ;;  %v1043_v54 = vmul.f32 %v703_v36, %v703_v36 }
 0x151   : > { %v972_v51 = vadd.f32 %v971_v45, %v703_v36  ;;  %v1105_v55 = vadd.f32 %v1104_v42, %v1042_v41  ;;  %912 = vst [vmem:[%s2051_s8 + $0x98] sm:$0xff] %v714_v46  ;;  %v706_v57 = vadd.f32 %v2045_v40, %v705_v47  ;;  %v2184_v59 = vadd.f32 %v2045_v40, %v833_v50 }
 0x152   : > { %v1484_v58 = vpop.f32.mrf.mxu0  ;;  %944 = vst [vmem:[%s2051_s8 + $0x198] sm:$0xff] %v2177_v49  ;;  %v1516_v60 = vpop.f32.mrf.mxu1  ;;  %v1046_v17 = vmul.f32 %v714_v46, %v714_v46 }
 0x153   : > { %v1106_v62 = vadd.f32 %v1105_v55, %v1043_v54  ;;  %910 = vst [vmem:[%s2051_s8 + $0x88] sm:$0xff] %v706_v57  ;;  %v973_v63 = vadd.f32 %v972_v51, %v706_v57  ;;  %v1044_v1 = vmul.f32 %v706_v57, %v706_v57  ;;  %v727_v2 = vadd.f32 %v1484_v58, %v2045_v40 }
 0x154   : > { %v718_v3 = vpop.f32.mrf.mxu0  ;;  %942 = vst [vmem:[%s2051_s8 + $0x188] sm:$0xff] %v2184_v59  ;;  %v2191_v4 = vadd.f32 %v1516_v60, %v2045_v40  ;;  %v846_v6 = vpop.f32.mrf.mxu1 }
 0x155   : > { %v974_v9 = vadd.f32 %v973_v63, %v711_v27  ;;  %v1107_v10 = vadd.f32 %v1106_v62, %v1044_v1  ;;  %915 = vst [vmem:[%s2051_s8 + $0xb0] sm:$0xff] %v727_v2  ;;  %v719_v11 = vadd.f32 %v2045_v40, %v718_v3  ;;  %v2198_v15 = vadd.f32 %v2045_v40, %v846_v6 }
 0x156   : > { %v1485_v12 = vpop.f32.mrf.mxu0  ;;  %947 = vst [vmem:[%s2051_s8 + $0x1b0] sm:$0xff] %v2191_v4  ;;  %v1517_v16 = vpop.f32.mrf.mxu1  ;;  %v1049_v47 = vmul.f32 %v727_v2, %v727_v2 }
 0x157   : > { %v1108_v18 = vadd.f32 %v1107_v10, %v1045_v8  ;;  %913 = vst [vmem:[%s2051_s8 + $0xa0] sm:$0xff] %v719_v11  ;;  %v975_v19 = vadd.f32 %v974_v9, %v714_v46  ;;  %v730_v20 = vadd.f32 %v1485_v12, %v2045_v40  ;;  %945 = vst [vmem:[%s2051_s8 + $0x1a0] sm:$0xff] %v2198_v15 }
 0x158   : > { %v721_v23 = vpop.f32.mrf.mxu0  ;;  %v2205_v24 = vadd.f32 %v1517_v16, %v2045_v40  ;;  %v849_v25 = vpop.f32.mrf.mxu1  ;;  %v1047_v27 = vmul.f32 %v719_v11, %v719_v11 }
 0x159   : > { %v976_v26 = vadd.f32 %v975_v19, %v719_v11  ;;  %v1109_v29 = vadd.f32 %v1108_v18, %v1046_v17  ;;  %916 = vst [vmem:[%s2051_s8 + $0xb8] sm:$0xff] %v730_v20  ;;  %v722_v31 = vadd.f32 %v2045_v40, %v721_v23  ;;  %v2212_v33 = vadd.f32 %v2045_v40, %v849_v25 }
 0x15a   : > { %v1488_v32 = vpop.f32.mrf.mxu0  ;;  %948 = vst [vmem:[%s2051_s8 + $0x1b8] sm:$0xff] %v2205_v24  ;;  %v1520_v34 = vpop.f32.mrf.mxu1  ;;  %v1050_v60 = vmul.f32 %v730_v20, %v730_v20 }
 0x15b   : > { %v1110_v36 = vadd.f32 %v1109_v29, %v1047_v27  ;;  %914 = vst [vmem:[%s2051_s8 + $0xa8] sm:$0xff] %v722_v31  ;;  %v977_v37 = vadd.f32 %v976_v26, %v722_v31  ;;  %v1048_v39 = vmul.f32 %v722_v31, %v722_v31  ;;  %v743_v41 = vadd.f32 %v1488_v32, %v2045_v40 }
 0x15c   : > { %v734_v42 = vpop.f32.mrf.mxu0  ;;  %946 = vst [vmem:[%s2051_s8 + $0x1a8] sm:$0xff] %v2212_v33  ;;  %v2219_v45 = vadd.f32 %v1520_v34, %v2045_v40  ;;  %v862_v46 = vpop.f32.mrf.mxu1 }
 0x15d   : > { %v978_v50 = vadd.f32 %v977_v37, %v727_v2  ;;  %v1111_v51 = vadd.f32 %v1110_v36, %v1048_v39  ;;  %919 = vst [vmem:[%s2051_s8 + $0xd0] sm:$0xff] %v743_v41  ;;  %v735_v54 = vadd.f32 %v2045_v40, %v734_v42  ;;  %v2226_v57 = vadd.f32 %v2045_v40, %v862_v46 }
 0x15e   : > { %v1489_v55 = vpop.f32.mrf.mxu0  ;;  %951 = vst [vmem:[%s2051_s8 + $0x1d0] sm:$0xff] %v2219_v45  ;;  %v1521_v58 = vpop.f32.mrf.mxu1  ;;  %v1053_v29 = vmul.f32 %v743_v41, %v743_v41 }
 0x15f   : > { %v1112_v62 = vadd.f32 %v1111_v51, %v1049_v47  ;;  %917 = vst [vmem:[%s2051_s8 + $0xc0] sm:$0xff] %v735_v54  ;;  %v979_v63 = vadd.f32 %v978_v50, %v730_v20  ;;  %v746_v1 = vadd.f32 %v1489_v55, %v2045_v40  ;;  %949 = vst [vmem:[%s2051_s8 + $0x1c0] sm:$0xff] %v2226_v57 }
 0x160   : > { %v737_v2 = vpop.f32.mrf.mxu0  ;;  %v2233_v3 = vadd.f32 %v1521_v58, %v2045_v40  ;;  %v865_v6 = vpop.f32.mrf.mxu1  ;;  %v1051_v9 = vmul.f32 %v735_v54, %v735_v54 }
 0x161   : > { %v980_v8 = vadd.f32 %v979_v63, %v735_v54  ;;  %v1113_v10 = vadd.f32 %v1112_v62, %v1050_v60  ;;  %920 = vst [vmem:[%s2051_s8 + $0xd8] sm:$0xff] %v746_v1  ;;  %v738_v11 = vadd.f32 %v2045_v40, %v737_v2  ;;  %v2240_v16 = vadd.f32 %v2045_v40, %v865_v6 }
 0x162   : > { %v1492_v12 = vpop.f32.mrf.mxu0  ;;  %952 = vst [vmem:[%s2051_s8 + $0x1d8] sm:$0xff] %v2233_v3  ;;  %v1524_v17 = vpop.f32.mrf.mxu1  ;;  %v1054_v42 = vmul.f32 %v746_v1, %v746_v1 }
 0x163   : > { %v1114_v18 = vadd.f32 %v1113_v10, %v1051_v9  ;;  %918 = vst [vmem:[%s2051_s8 + $0xc8] sm:$0xff] %v738_v11  ;;  %v981_v19 = vadd.f32 %v980_v8, %v738_v11  ;;  %v1052_v20 = vmul.f32 %v738_v11, %v738_v11  ;;  %v759_v23 = vadd.f32 %v1492_v12, %v2045_v40 }
 0x164   : > { %v750_v25 = vpop.f32.mrf.mxu0  ;;  %950 = vst [vmem:[%s2051_s8 + $0x1c8] sm:$0xff] %v2240_v16  ;;  %v2247_v26 = vadd.f32 %v1524_v17, %v2045_v40  ;;  %v878_v27 = vpop.f32.mrf.mxu1 }
 0x165   : > { %v982_v31 = vadd.f32 %v981_v19, %v743_v41  ;;  %v1115_v32 = vadd.f32 %v1114_v18, %v1052_v20  ;;  %923 = vst [vmem:[%s2051_s8 + $0xf0] sm:$0xff] %v759_v23  ;;  %v751_v34 = vadd.f32 %v2045_v40, %v750_v25  ;;  %v2254_v37 = vadd.f32 %v2045_v40, %v878_v27 }
 0x166   : > { %v1493_v36 = vpop.f32.mrf.mxu0  ;;  %955 = vst [vmem:[%s2051_s8 + $0x1f0] sm:$0xff] %v2247_v26  ;;  %v1525_v39 = vpop.f32.mrf.mxu1  ;;  %v1057_v8 = vmul.f32 %v759_v23, %v759_v23 }
 0x167   : > { %v1116_v46 = vadd.f32 %v1115_v32, %v1053_v29  ;;  %921 = vst [vmem:[%s2051_s8 + $0xe0] sm:$0xff] %v751_v34  ;;  %v983_v41 = vadd.f32 %v982_v31, %v746_v1  ;;  %v762_v47 = vadd.f32 %v1493_v36, %v2045_v40  ;;  %953 = vst [vmem:[%s2051_s8 + $0x1e0] sm:$0xff] %v2254_v37 }
 0x168   : > { %v753_v50 = vpop.f32.mrf.mxu0  ;;  %v2263_v51 = vadd.f32 %v1525_v39, %v2045_v40  ;;  %v881_v54 = vpop.f32.mrf.mxu1  ;;  %v1055_v58 = vmul.f32 %v751_v34, %v751_v34 }
 0x169   : > { %v984_v55 = vadd.f32 %v983_v41, %v751_v34  ;;  %v1117_v60 = vadd.f32 %v1116_v46, %v1054_v42  ;;  %924 = vst [vmem:[%s2051_s8 + $0xf8] sm:$0xff] %v762_v47  ;;  %v754_v62 = vadd.f32 %v2045_v40, %v753_v50  ;;  %v2277_v63 = vadd.f32 %v2045_v40, %v881_v54 }
 0x16a   : > { %956 = vst [vmem:[%s2051_s8 + $0x1f8] sm:$0xff] %v2263_v51 }
 0x16b   : > { %v1118_v1 = vadd.f32 %v1117_v60, %v1055_v58  ;;  %922 = vst [vmem:[%s2051_s8 + $0xe8] sm:$0xff] %v754_v62  ;;  %v985_v2 = vadd.f32 %v984_v55, %v754_v62  ;;  %v1056_v6 = vmul.f32 %v754_v62, %v754_v62  ;;  %954 = vst [vmem:[%s2051_s8 + $0x1e8] sm:$0xff] %v2277_v63 }
 0x16d   : > { %v986_v9 = vadd.f32 %v985_v2, %v759_v23  ;;  %v1119_v10 = vadd.f32 %v1118_v1, %v1056_v6 }
 0x16e   : > { %1720 = shalt.err (!%p1717_p0)
}
 0x16f   : > { %s1721_s17 = scalar_lea.hbm %s2270_s28, 8192  ;;  %s1725_s10 = scalar_lea.hbm %s2489_s3, 32768 }
 0x170   : > { %p1722_p5 = scmp.ne.s32.totalorder %s2270_s28, %s1721_s17  ;;  %p1726_p4 = scmp.lt.s32.totalorder %s2270_s28, %s2489_s3 }
 0x171   : > { %p1727_p6 = scmp.lt.s32.totalorder %s1725_s10, %s1721_s17 }
 0x172   : > { %p1723_p2 = pnand %p1722_p5, %p2510_p10 }
 0x173   : > { %p1728_p8 = por %p1727_p6, %p1726_p4 }
 0x174   : > { %p1724_p1 = pneg %p1723_p2 }
 0x176   : > { %p1729_p3 = pnand %p1728_p8, %p1724_p1 }
 0x178   : > { %1732 = shalt.err (!%p1729_p3)
}
 0x179   : > { %s1838_s11 = smov 128   ;;  %s1839_s29 = smov 8   ;;  %v1058_v40 = vmul.f32 %v762_v47, %v762_v47  ;;  %v1120_v11 = vadd.f32 %v1119_v10, %v1057_v8  ;;  %v987_v12 = vadd.f32 %v986_v9, %v762_v47  ;;  %v1059_v17 = vmul.f32 %v2058_v48, %v2058_v48 }
 0x17a   : > { %1548 = dma.vmem_to_hbm [thread:$0]  (%p2510_p10), %s2272_s7, 8192, %s2270_s28, %s1162_s15, %s1838_s11, %s1838_s11, %s1839_s29   ;;  %v1060_v23 = vmul.f32 %v2072_v56, %v2072_v56  ;;  %v1061_v27 = vmul.f32 %v2049_v44, %v2049_v44  ;;  %v1062_v32 = vmul.f32 %v2065_v52, %v2065_v52  ;;  %v1063_v39 = vmul.f32 %v2086_v7, %v2086_v7 }
 0x17b   : > { %v988_v18 = vadd.f32 %v987_v12, %v2058_v48  ;;  %v1121_v19 = vadd.f32 %v1120_v11, %v1058_v40  ;;  %v1064_v41 = vmul.f32 %v2100_v21, %v2100_v21  ;;  %v1067_v58 = vmul.f32 %v2114_v35, %v2114_v35  ;;  %s1166_s7 = sand.u32 1, %s1893_s22   ;;  %s1400_s28 = sshll.u32 %s1893_s22, 4 }
 0x17c   : > { %v1068_v1 = vmul.f32 %v2128_v53, %v2128_v53  ;;  %v1071_v10 = vmul.f32 %v2142_v5, %v2142_v5  ;;  %v1072_v12 = vmul.f32 %v2156_v22, %v2156_v22  ;;  %s267_s15 = scalar_lea.vmem [#allocation8], %s1995_s23  ;;  %s273_s12 = scalar_lea.vmem [#allocation10], %s1995_s23 }
 0x17d   : > { %v989_v20 = vadd.f32 %v988_v18, %v2072_v56  ;;  %v1122_v25 = vadd.f32 %v1121_v19, %v1059_v17  ;;  %s1199_s16 = sshll.u32 %s267_s15, 4  ;;  %s1212_s9 = sshll.u32 %s273_s12, 4  ;;  %s2412_s16 = int_to_ptr.vmem [resolvable:$true] %s1199_s16  ;;  %s2419_s9 = int_to_ptr.vmem [resolvable:$true] %s1212_s9 }
 0x17e   : > { %s2410_s24 = scalar_lea.hbm %s2490_s4, %s1400_s28  ;;  %s2417_s10 = scalar_lea.hbm %s2491_s5, %s1400_s28 }
 0x17f   : > { %v990_v29 = vadd.f32 %v989_v20, %v2049_v44  ;;  %v1123_v31 = vadd.f32 %v1122_v25, %v1060_v23  ;;  %v1065_v44 = vmul.f32 %v2079_v0, %v2079_v0  ;;  %v1075_v23 = vmul.f32 %v2170_v38, %v2170_v38  ;;  %s2421_s8 = scalar_lea.sflag [#allocation9], %s1166_s7  ;;  %s1733_s6 = scalar_lea.vmem %s2412_s16, 16 }
 0x180   : > { %p1734_p7 = scmp.ne.s32.totalorder %s2412_s16, %s1733_s6  ;;  %s1840_s11 = smov [#allocation8]  }
 0x181   : > { %v1124_v34 = vadd.f32 %v1123_v31, %v1061_v27  ;;  %v991_v36 = vadd.f32 %v990_v29, %v2065_v52  ;;  %v1066_v52 = vmul.f32 %v2093_v14, %v2093_v14  ;;  %v1076_v29 = vmul.f32 %v2184_v59, %v2184_v59  ;;  %s1737_s29 = sshll.u32 %s1840_s11, 4  ;;  %s1738_s29 = int_to_ptr.vmem [resolvable:$false] %s1737_s29 }
 0x182   : > { %p1735_p9 = pnand %p1734_p7, %p2510_p10  ;;  %s1739_s27 = scalar_lea.vmem %s1738_s29, 32 }
 0x183   : > { %v992_v48 = vadd.f32 %v991_v36, %v2086_v7  ;;  %v1125_v42 = vadd.f32 %v1124_v34, %v1062_v32  ;;  %p1740_p12 = scmp.lt.s32.totalorder %s2412_s16, %s1738_s29  ;;  %p1741_p13 = scmp.lt.s32.totalorder %s1739_s27, %s1733_s6 }
 0x184   : > { %p1736_p11 = pneg %p1735_p9 }
 0x185   : > { %v1126_v56 = vadd.f32 %v1125_v42, %v1063_v39  ;;  %v993_v46 = vadd.f32 %v992_v48, %v2100_v21  ;;  %v1079_v48 = vmul.f32 %v2198_v15, %v2198_v15  ;;  %p1742_p0 = por %p1741_p13, %p1740_p12 }
 0x187   : > { %v994_v47 = vadd.f32 %v993_v46, %v2079_v0  ;;  %v1127_v50 = vadd.f32 %v1126_v56, %v1064_v41  ;;  %v1069_v0 = vmul.f32 %v2107_v28, %v2107_v28  ;;  %v1080_v56 = vmul.f32 %v2212_v33, %v2212_v33  ;;  %p1743_p5 = pnand %p1742_p0, %p1736_p11 }
 0x189   : > { %v1128_v54 = vadd.f32 %v1127_v50, %v1065_v44  ;;  %v995_v55 = vadd.f32 %v994_v47, %v2093_v14  ;;  %v1070_v14 = vmul.f32 %v2121_v43, %v2121_v43  ;;  %v1083_v50 = vmul.f32 %v2226_v57, %v2226_v57 }
 0x18b   : > { %v996_v7 = vadd.f32 %v995_v55, %v2114_v35  ;;  %v1129_v60 = vadd.f32 %v1128_v54, %v1066_v52  ;;  %v1084_v55 = vmul.f32 %v2240_v16, %v2240_v16 }
 0x18d   : > { %v1130_v62 = vadd.f32 %v1129_v60, %v1067_v58  ;;  %v997_v21 = vadd.f32 %v996_v7, %v2128_v53 }
 0x18f   : > { %v998_v2 = vadd.f32 %v997_v21, %v2107_v28  ;;  %v1131_v6 = vadd.f32 %v1130_v62, %v1068_v1  ;;  %v1073_v28 = vmul.f32 %v2135_v61, %v2135_v61  ;;  %v1087_v21 = vmul.f32 %v2254_v37, %v2254_v37 }
 0x191   : > { %v1132_v8 = vadd.f32 %v1131_v6, %v1069_v0  ;;  %v999_v9 = vadd.f32 %v998_v2, %v2121_v43  ;;  %v1074_v43 = vmul.f32 %v2149_v13, %v2149_v13  ;;  %v1089_v2 = vmul.f32 %v2247_v26, %v2247_v26 }
 0x193   : > { %v1000_v35 = vadd.f32 %v999_v9, %v2142_v5  ;;  %v1133_v40 = vadd.f32 %v1132_v8, %v1070_v14  ;;  %v1090_v14 = vmul.f32 %v2263_v51, %v2263_v51 }
 0x195   : > { %v1134_v11 = vadd.f32 %v1133_v40, %v1071_v10  ;;  %v1001_v53 = vadd.f32 %v1000_v35, %v2156_v22 }
 0x197   : > { %v1002_v17 = vadd.f32 %v1001_v53, %v2135_v61  ;;  %v1135_v18 = vadd.f32 %v1134_v11, %v1072_v12  ;;  %v1077_v61 = vmul.f32 %v2163_v30, %v2163_v30 }
 0x199   : > { %v1136_v19 = vadd.f32 %v1135_v18, %v1073_v28  ;;  %v1003_v20 = vadd.f32 %v1002_v17, %v2149_v13  ;;  %v1078_v13 = vmul.f32 %v2177_v49, %v2177_v49 }
 0x19b   : > { %v1004_v5 = vadd.f32 %v1003_v20, %v2170_v38  ;;  %v1137_v25 = vadd.f32 %v1136_v19, %v1074_v43 }
 0x19d   : > { %v1138_v27 = vadd.f32 %v1137_v25, %v1075_v23  ;;  %v1005_v22 = vadd.f32 %v1004_v5, %v2184_v59 }
 0x19f   : > { %v1006_v31 = vadd.f32 %v1005_v22, %v2163_v30  ;;  %v1139_v32 = vadd.f32 %v1138_v27, %v1076_v29  ;;  %v1081_v30 = vmul.f32 %v2191_v4, %v2191_v4 }
 0x1a1   : > { %v1140_v34 = vadd.f32 %v1139_v32, %v1077_v61  ;;  %v1007_v36 = vadd.f32 %v1006_v31, %v2177_v49  ;;  %v1082_v49 = vmul.f32 %v2205_v24, %v2205_v24 }
 0x1a3   : > { %v1008_v38 = vadd.f32 %v1007_v36, %v2198_v15  ;;  %v1141_v39 = vadd.f32 %v1140_v34, %v1078_v13 }
 0x1a5   : > { %v1142_v42 = vadd.f32 %v1141_v39, %v1079_v48  ;;  %v1009_v59 = vadd.f32 %v1008_v38, %v2212_v33 }
 0x1a7   : > { %v1010_v46 = vadd.f32 %v1009_v59, %v2191_v4  ;;  %v1143_v41 = vadd.f32 %v1142_v42, %v1080_v56  ;;  %v1085_v4 = vmul.f32 %v2219_v45, %v2219_v45 }
 0x1a9   : > { %v1144_v44 = vadd.f32 %v1143_v41, %v1081_v30  ;;  %v1011_v47 = vadd.f32 %v1010_v46, %v2205_v24  ;;  %v1086_v24 = vmul.f32 %v2233_v3, %v2233_v3 }
 0x1ab   : > { %v1012_v15 = vadd.f32 %v1011_v47, %v2226_v57  ;;  %v1145_v52 = vadd.f32 %v1144_v44, %v1082_v49 }
 0x1ad   : > { %v1146_v54 = vadd.f32 %v1145_v52, %v1083_v50  ;;  %v1013_v33 = vadd.f32 %v1012_v15, %v2240_v16 }
 0x1af   : > { %v1014_v7 = vadd.f32 %v1013_v33, %v2219_v45  ;;  %v1147_v58 = vadd.f32 %v1146_v54, %v1084_v55  ;;  %v1088_v45 = vmul.f32 %v2277_v63, %v2277_v63 }
 0x1b1   : > { %v1148_v60 = vadd.f32 %v1147_v58, %v1085_v4  ;;  %v1015_v62 = vadd.f32 %v1014_v7, %v2233_v3 }
 0x1b3   : > { %v1016_v57 = vadd.f32 %v1015_v62, %v2254_v37  ;;  %v1149_v1 = vadd.f32 %v1148_v60, %v1086_v24 }
 0x1b5   : > { %v1150_v0 = vadd.f32 %v1149_v1, %v1087_v21  ;;  %v1017_v16 = vadd.f32 %v1016_v57, %v2277_v63 }
 0x1b7   : > { %v1018_v3 = vadd.f32 %v1017_v16, %v2247_v26  ;;  %v1151_v6 = vadd.f32 %v1150_v0, %v1088_v45 }
 0x1b9   : > { %v1019_v37 = vadd.f32 %v1018_v3, %v2263_v51  ;;  %v1152_v8 = vadd.f32 %v1151_v6, %v1089_v2 }
 0x1bb   : > { %v1020_v9 = vrot.slane %v1019_v37, 4  ;;  %v1153_v35 = vadd.f32 %v1152_v8, %v1090_v14 }
 0x1bd   : > { %v1021_v10 = vadd.f32 %v1020_v9, %v1019_v37  ;;  %v1154_v63 = vrot.slane %v1153_v35, 4 }
 0x1bf   : > { %v1022_v40 = vrot.slane %v1021_v10, 2  ;;  %v1155_v11 = vadd.f32 %v1154_v63, %v1153_v35 }
 0x1c1   : > { %v1156_v53 = vrot.slane %v1155_v11, 2  ;;  %v1023_v12 = vadd.f32 %v1022_v40, %v1021_v10 }
 0x1c3   : > { %v1024_v26 = vrot.slane %v1023_v12, 1  ;;  %v1157_v28 = vadd.f32 %v1156_v53, %v1155_v11 }
 0x1c5   : > { %v1025_v51 = vadd.f32 %v1024_v26, %v1023_v12  ;;  %v1158_v17 = vrot.slane %v1157_v28, 1 }
 0x1c7   : > { %1026 = vst [vmem:[%s267_s15] sm:$0x1] %v1025_v51  ;;  %v1159_v18 = vadd.f32 %v1158_v17, %v1157_v28 }
 0x1c8   : > { %1746 = shalt.err (!%p1743_p5)
}
 0x1c9   : > { %s1747_s7 = scalar_lea.hbm %s2410_s24, 16  ;;  %s1751_s17 = scalar_lea.hbm %s2490_s4, 64 }
 0x1ca   : > { %p1748_p2 = scmp.ne.s32.totalorder %s2410_s24, %s1747_s7  ;;  %p1752_p6 = scmp.lt.s32.totalorder %s2410_s24, %s2490_s4 }
 0x1cb   : > { %p1753_p8 = scmp.lt.s32.totalorder %s1751_s17, %s1747_s7 }
 0x1cc   : > { %p1749_p1 = pnand %p1748_p2, %p2510_p10 }
 0x1cd   : > { %p1754_p3 = por %p1753_p8, %p1752_p6 }
 0x1ce   : > { %p1750_p4 = pneg %p1749_p1 }
 0x1d0   : > { %p1755_p7 = pnand %p1754_p3, %p1750_p4 }
 0x1d2   : > { %1758 = shalt.err (!%p1755_p7)
}
 0x1d3   : > { %1549 = dma.vmem_to_hbm [thread:$0]  (%p2510_p10), %s2412_s16, 16, %s2410_s24, %s2421_s8   ;;  %1160 = vst [vmem:[%s273_s12] sm:$0x1] %v1159_v18 }
 0x1d4   : > { %s1759_s6 = scalar_lea.vmem %s2419_s9, 16  ;;  %s1841_s11 = smov [#allocation10]  }
 0x1d5   : > { %p1760_p9 = scmp.ne.s32.totalorder %s2419_s9, %s1759_s6  ;;  %s1763_s29 = sshll.u32 %s1841_s11, 4  ;;  %s1764_s29 = int_to_ptr.vmem [resolvable:$false] %s1763_s29 }
 0x1d6   : > { %s1765_s27 = scalar_lea.vmem %s1764_s29, 32  ;;  %p1766_p13 = scmp.lt.s32.totalorder %s2419_s9, %s1764_s29 }
 0x1d7   : > { %p1761_p11 = pnand %p1760_p9, %p2510_p10  ;;  %p1767_p0 = scmp.lt.s32.totalorder %s1765_s27, %s1759_s6 }
 0x1d9   : > { %p1762_p12 = pneg %p1761_p11  ;;  %p1768_p5 = por %p1767_p0, %p1766_p13 }
 0x1db   : > { %p1769_p2 = pnand %p1768_p5, %p1762_p12 }
 0x1dd   : > { %1772 = shalt.err (!%p1769_p2)
}
 0x1de   : > { %s1773_s23 = scalar_lea.hbm %s2417_s10, 16  ;;  %s1777_s24 = scalar_lea.hbm %s2491_s5, 64 }
 0x1df   : > { %p1774_p1 = scmp.ne.s32.totalorder %s2417_s10, %s1773_s23  ;;  %p1778_p8 = scmp.lt.s32.totalorder %s2417_s10, %s2491_s5 }
 0x1e0   : > { %p1779_p3 = scmp.lt.s32.totalorder %s1777_s24, %s1773_s23 }
 0x1e1   : > { %p1775_p4 = pnand %p1774_p1, %p2510_p10 }
 0x1e2   : > { %p1780_p7 = por %p1779_p3, %p1778_p8 }
 0x1e3   : > { %p1776_p6 = pneg %p1775_p4 }
 0x1e5   : > { %p1781_p9 = pnand %p1780_p7, %p1776_p6 }
 0x1e7   : > { %1784 = shalt.err (!%p1781_p9)
}
 0x1e8   : > { %1550 = dma.vmem_to_hbm [thread:$0]  (%p2510_p10), %s2419_s9, 16, %s2417_s10, %s2421_s8  }
 0x1e9 PF: > { %p1575_p11 = scmp.ge.s32.totalorder %s1831_s21, 2  ;;  %s1224_s15 = sand.u32 1, %s1819_s18  }
 0x1ea   : > { %p2511_p12 = scmp.ne.s32.totalorder %s2499_s25, 0  ;;  %s1225_s17 = scalar_lea.sflag [#allocation4], %s1224_s15 }
 0x1ec   : > { %p1563_p13 = pnand %p1575_p11, %p2511_p12 }
 0x1ee   : > { %p1564_p0 = pneg %p1563_p13 }
 0x1f0   : > { %1810 = dma.done.wait (%p1564_p0), %s1225_s17, 8192  }
 0x1f1   : > { %1812 = vsyncadd (%p1564_p0), %s1225_s17, 4294959104  ;;  %s2512_s22 = sadd.s32 4294967294, %s1831_s21  }
 0x1f2   : > { %s1233_s26 = sand.u32 1, %s2512_s22  }
 0x1f3   : > { %s1234_s14 = scalar_lea.sflag [#allocation9], %s1233_s26 }
 0x1f4   : > { %1814 = dma.done.wait (%p1564_p0), %s1234_s14, 32  }
 0x1f5   : > { %1816 = vsyncadd (%p1564_p0), %s1234_s14, 4294967264  ;;  %p23_p10 = scmp.ge.s32.totalorder %s1927_s30, 6   ;;  %s2513_s18 = smov %s1823_s19 }
 0x1f6   : > { %s2514_s19 = smov %s1827_s20  ;;  %s2515_s20 = smov %s1947_s13 }
 0x1f7   : > { %s2516_s21 = smov %s1927_s30  ;;  %25 = sbr.rel (!%p23_p10) target bundleno = 8 (0x8), region = 113 }
 0x1fc   :  { %1246 = vsyncpa [#allocation3], 1 }
 0x1fd   :  { %1248 = vsyncpa [#allocation3 + $0x1], 1 }
 0x1fe   :  { %1249 = vsyncpa [#allocation6], 1 }
 0x1ff   :  { %1250 = vsyncpa [#allocation4], 1 }
 0x200   :  { %1252 = vsyncpa [#allocation4 + $0x1], 1 }
 0x201   :  { %1253 = vsyncpa [#allocation9], 1 }
 0x202   :  { %1255 = vsyncpa [#allocation9 + $0x1], 1 }

</bundles_post_ra>
